<compile_context>
chip_gen: v6e
topology: v6e:2x2x1
jax: 0.10.0
libtpu: 0.0.40
codegen_flags: <defaults>
</compile_context>

<pallas_src>
import jax
import jax.numpy as jnp
from jax.experimental import pallas as pl
from jax.experimental.pallas import tpu as pltpu


def _round_up(x, m):
    return (x + m - 1) // m * m


def _patch_embed_kernel(p_ref, w_ref, b_ref, o_ref):
    # One MXU GEMM tile with f32 accumulation; bias added on the VPU in the
    # f32 epilogue (hidden behind the MXU), then cast to the output dtype.
    acc = jnp.dot(p_ref[...], w_ref[...], preferred_element_type=jnp.float32)
    o_ref[...] = (acc + b_ref[...]).astype(o_ref.dtype)


def prepare_patch_embed_params(weight, bias, *, compute_dtype=jnp.bfloat16):
    """One-time parameter prep (hoisted out of the per-call hot path).

    weight: [E, C, kh, kw] (Conv2d layout), bias: [E].
    Returns (w_flat [K, E] in compute_dtype, bias_row [1, E] f32),
    with K = C*kh*kw flattened in (c, kh, kw) order.
    """
    E = weight.shape[0]
    K = weight.shape[1] * weight.shape[2] * weight.shape[3]
    w_flat = jnp.asarray(weight).reshape(E, K).T.astype(compute_dtype)   # [K, E]
    b_row = jnp.asarray(bias).astype(jnp.float32).reshape(1, E)          # [1, E]
    return w_flat, b_row


def _choose_tm(M, tm_max):
    """Pick the GEMM M-tile: multiple of 256 (>=16 for tiny M), minimal
    M-padding, >=2 grid steps when possible (both TCs on v7x), then as large
    as possible to amortize the ~0.35us per-grid-step overhead."""
    if M < 256:
        return _round_up(max(M, 16), 16)
    hi = max(256, (tm_max // 256) * 256)
    cands = range(256, hi + 1, 256)

    def cost(t):
        mp = _round_up(M, t)
        steps = mp // t
        return (mp - M,                      # least padding (extra HBM + flops)
                0 if steps >= 2 else 1,      # prefer >=2 steps (megacore)
                -t)                          # then the largest tile
    return min(cands, key=cost)


def patch_embed_forward(x, w_flat, b_row, kernel_size, stride, *,
                        out_dtype=jnp.bfloat16, compute_dtype=jnp.bfloat16,
                        tm=1024):
    """x: [B, C, H, W] (NCHW). w_flat/b_row from prepare_patch_embed_params.
    Returns [B, Hp, Wp, E] (== Conv2d(x).permute(0, 2, 3, 1)) in out_dtype."""
    kh, kw = kernel_size
    sh, sw = stride
    assert (kh, kw) == (sh, sw), "PatchEmbed uses kernel_size == stride"
    B, C, H, W = x.shape
    K, E = w_flat.shape
    assert K == C * kh * kw, "w_flat must be the flattened Conv2d weight"
    Hp, Wp = H // kh, W // kw
    M = B * Hp * Wp

    # ---- Patch extraction (im2col; exact for the non-overlapping case):
    # one fused XLA reshape+transpose+cast pass producing the [M, K] lhs.
    # (See TODO(synk) above about fusing this into the kernel.)
    patches = (x.reshape(B, C, Hp, kh, Wp, kw)
                 .transpose(0, 2, 4, 1, 3, 5)
                 .reshape(M, K)
                 .astype(compute_dtype))

    # ---- Tile / VMEM budgeting (explicit so v7x's 64 MiB ceiling is safe).
    cb = jnp.dtype(compute_dtype).itemsize
    ob = jnp.dtype(out_dtype).itemsize
    resident = K * E * cb + E * 4              # weight + bias (grid-resident)
    per_row = 2 * K * cb + 2 * E * ob          # lhs + out tiles, double-buffered
    budget = 40 << 20                          # working-set target << 64 MiB
    tm_cap = max(256, int((budget - resident) // max(per_row, 1)) // 256 * 256)
    TM = _choose_tm(M, min(tm, tm_cap))
    Mp = _round_up(M, TM)
    if Mp != M:
        patches = jnp.pad(patches, ((0, Mp - M), (0, 0)))

    grid = (Mp // TM,)
    # Worst-case VMEM use (weight/bias double-buffered in the fallback path).
    vmem_worst = 2 * resident + TM * per_row
    vmem_limit = int(min(max(2 * vmem_worst, 32 << 20), 56 << 20))
    vmem_limit = max(vmem_limit, vmem_worst + (4 << 20))

    cost = pl.CostEstimate(
        flops=2 * Mp * K * E,
        transcendentals=0,
        bytes_accessed=Mp * K * cb + K * E * cb + E * 4 + Mp * E * ob,
    )

    def build(single_buffer_params):
        # Weight/bias index_maps are constant across the grid; a second
        # pipeline buffer for them is dead VMEM -> request single buffering.
        extra = ({"pipeline_mode": pl.Buffered(1)} if single_buffer_params
                 else {})
        return pl.pallas_call(
            _patch_embed_kernel,
            out_shape=jax.ShapeDtypeStruct((Mp, E), out_dtype),
            grid_spec=pltpu.PrefetchScalarGridSpec(
                num_scalar_prefetch=0,
                grid=grid,
                in_specs=[
                    pl.BlockSpec((TM, K), lambda i: (i, 0)),            # lhs tile
                    pl.BlockSpec((K, E), lambda i: (0, 0), **extra),    # weight
                    pl.BlockSpec((1, E), lambda i: (0, 0), **extra),    # bias
                ],
                out_specs=pl.BlockSpec((TM, E), lambda i: (i, 0)),
            ),
            compiler_params=pltpu.CompilerParams(
                dimension_semantics=("parallel",),  # shard M across TCs on v7x
                vmem_limit_bytes=vmem_limit,
            ),
            cost_estimate=cost,
        )

    try:
        out = build(True)(patches, w_flat, b_row)
    except Exception:
        # Pallas build without BlockSpec pipeline_mode / Buffered(1) support:
        # fall back to default double buffering (VMEM budget already covers it).
        out = build(False)(patches, w_flat, b_row)

    if Mp != M:
        out = out[:M]
    # Contiguous row-major reshape: free (no extra HBM pass).
    return out.reshape(B, Hp, Wp, E)


if __name__ == "__main__":
    # Small, forward-consistent shapes.
    B, C, H, W = 2, 4, 16, 16
    kernel_size = (8, 8)
    stride = (8, 8)
    embed_dim = 32

    key = jax.random.PRNGKey(0)
    kx, kw_, kb = jax.random.split(key, 3)

    x = jax.random.normal(kx, (B, C, H, W), dtype=jnp.float32)
    fan_in = C * kernel_size[0] * kernel_size[1]
    bound = 1.0 / (fan_in ** 0.5)
    weight = jax.random.uniform(
        kw_, (embed_dim, C, kernel_size[0], kernel_size[1]),
        minval=-bound, maxval=bound, dtype=jnp.float32)
    bias = jax.random.uniform(
        kb, (embed_dim,), minval=-bound, maxval=bound, dtype=jnp.float32)

    # One-time parameter prep (weight transpose/cast hoisted out of hot path).
    w_flat, b_row = prepare_patch_embed_params(weight, bias)

    out = patch_embed_forward(x, w_flat, b_row, kernel_size, stride)
    out = jax.block_until_ready(out)

    # Reference: f32 conv over the same bf16-quantized operands, rounded to
    # the kernel's bf16 output dtype (mirrors the kernel's deliberate
    # bf16-in / f32-accumulate / bf16-out precision choice).
    xb = x.astype(jnp.bfloat16).astype(jnp.float32)
    wb = weight.astype(jnp.bfloat16).astype(jnp.float32)
    ref = jax.lax.conv_general_dilated(
        xb, wb, window_strides=stride, padding="VALID",
        dimension_numbers=("NCHW", "OIHW", "NCHW"))
    ref = ref + bias.reshape(1, embed_dim, 1, 1)
    ref = jnp.transpose(ref, (0, 2, 3, 1)).astype(jnp.bfloat16)

    Hp, Wp = H // stride[0], W // stride[1]
    assert out.shape == (B, Hp, Wp, embed_dim)
    assert out.dtype == jnp.dtype(jnp.bfloat16)
    diff = float(jnp.max(jnp.abs(out.astype(jnp.float32) - ref.astype(jnp.float32))))
    assert diff < 2e-2, diff

    print("KERNEL_OK")
</pallas_src>

<mosaic_0001>
module attributes {stable_mosaic.version = 11 : i64} {
  func.func @_patch_embed_kernel(%arg0: i32, %arg1: memref<16x256xbf16, #tpu.memory_space<vmem>>, %arg2: memref<256x32xbf16, #tpu.memory_space<vmem>>, %arg3: memref<1x32xf32, #tpu.memory_space<vmem>>, %arg4: memref<16x32xbf16, #tpu.memory_space<vmem>>) attributes {dimension_semantics = [#tpu.dimension_semantics<parallel>], iteration_bounds = array<i64: 1>, scalar_prefetch = 0 : i64, scratch_operands = 0 : i64, tpu.core_type = #tpu.core_type<tc>, window_params = [{transform_indices = @transform_0, window_bounds = array<i64: 16, 256>}, {pipeline_mode = #tpu.pipeline_mode<synchronous>, transform_indices = @transform_1, window_bounds = array<i64: 256, 32>}, {pipeline_mode = #tpu.pipeline_mode<synchronous>, transform_indices = @transform_2, window_bounds = array<i64: 1, 32>}, {transform_indices = @transform_3, window_bounds = array<i64: 16, 32>}]} {
    %c0 = arith.constant 0 : index
    %c0_0 = arith.constant 0 : index
    %0 = vector.load %arg1[%c0, %c0_0] : memref<16x256xbf16, #tpu.memory_space<vmem>>, vector<16x256xbf16>
    %c0_1 = arith.constant 0 : index
    %c0_2 = arith.constant 0 : index
    %1 = vector.load %arg2[%c0_1, %c0_2] : memref<256x32xbf16, #tpu.memory_space<vmem>>, vector<256x32xbf16>
    %cst = arith.constant dense<0.000000e+00> : vector<16x32xf32>
    %2 = tpu.matmul %0, %1, %cst {dimension_numbers = #tpu.dot_dimension_numbers<[1], [0], [0], [1], [0, 0, 1, 1], [], []>} : vector<16x256xbf16>, vector<256x32xbf16>, vector<16x32xf32> -> vector<16x32xf32>
    %c0_3 = arith.constant 0 : index
    %c0_4 = arith.constant 0 : index
    %3 = vector.load %arg3[%c0_3, %c0_4] : memref<1x32xf32, #tpu.memory_space<vmem>>, vector<1x32xf32>
    %4 = vector.broadcast %3 : vector<1x32xf32> to vector<16x32xf32>
    %5 = arith.addf %2, %4 : vector<16x32xf32>
    %6 = arith.truncf %5 : vector<16x32xf32> to vector<16x32xbf16>
    %c0_5 = arith.constant 0 : index
    %c0_6 = arith.constant 0 : index
    %7 = vector.load %arg4[%c0_5, %c0_6] : memref<16x32xbf16, #tpu.memory_space<vmem>>, vector<16x32xbf16>
    tpu.vector_store %arg4[%c0_5, %c0_6], %6 {strides = array<i32>} : memref<16x32xbf16, #tpu.memory_space<vmem>>, vector<16x32xbf16>,
    return
  }
  func.func @transform_0(%arg0: i32) -> (i32, i32) {
    %c0_i32 = arith.constant 0 : i32
    %c0_i32_0 = arith.constant 0 : i32
    return %arg0, %c0_i32 : i32, i32
  }
  func.func @transform_1(%arg0: i32) -> (i32, i32) {
    %c0_i32 = arith.constant 0 : i32
    %c0_i32_0 = arith.constant 0 : i32
    %c0_i32_1 = arith.constant 0 : i32
    return %c0_i32, %c0_i32_0 : i32, i32
  }
  func.func @transform_2(%arg0: i32) -> (i32, i32) {
    %c0_i32 = arith.constant 0 : i32
    %c0_i32_0 = arith.constant 0 : i32
    %c0_i32_1 = arith.constant 0 : i32
    return %c0_i32, %c0_i32_0 : i32, i32
  }
  func.func @transform_3(%arg0: i32) -> (i32, i32) {
    %c0_i32 = arith.constant 0 : i32
    %c0_i32_0 = arith.constant 0 : i32
    return %arg0, %c0_i32 : i32, i32
  }
}

module attributes {stable_mosaic.version = 11 : i64} {
  func.func @_patch_embed_kernel(%arg0: i32, %arg1: memref<16x256xbf16, #tpu.memory_space<vmem>>, %arg2: memref<256x32xbf16, #tpu.memory_space<vmem>>, %arg3: memref<1x32xf32, #tpu.memory_space<vmem>>, %arg4: memref<16x32xbf16, #tpu.memory_space<vmem>>) attributes {dimension_semantics = [#tpu.dimension_semantics<parallel>], iteration_bounds = array<i64: 1>, scalar_prefetch = 0 : i64, scratch_operands = 0 : i64, tpu.core_type = #tpu.core_type<tc>, window_params = [{transform_indices = @transform_0, window_bounds = array<i64: 16, 256>}, {pipeline_mode = #tpu.pipeline_mode<synchronous>, transform_indices = @transform_1, window_bounds = array<i64: 256, 32>}, {pipeline_mode = #tpu.pipeline_mode<synchronous>, transform_indices = @transform_2, window_bounds = array<i64: 1, 32>}, {transform_indices = @transform_3, window_bounds = array<i64: 16, 32>}]} {
    %c0 = arith.constant 0 : index
    %c0_0 = arith.constant 0 : index
    %0 = vector.load %arg1[%c0, %c0_0] : memref<16x256xbf16, #tpu.memory_space<vmem>>, vector<16x256xbf16>
    %c0_1 = arith.constant 0 : index
    %c0_2 = arith.constant 0 : index
    %1 = vector.load %arg2[%c0_1, %c0_2] : memref<256x32xbf16, #tpu.memory_space<vmem>>, vector<256x32xbf16>
    %cst = arith.constant dense<0.000000e+00> : vector<16x32xf32>
    %2 = tpu.matmul %0, %1, %cst {dimension_numbers = #tpu.dot_dimension_numbers<[1], [0], [0], [1], [0, 0, 1, 1], [], []>} : vector<16x256xbf16>, vector<256x32xbf16>, vector<16x32xf32> -> vector<16x32xf32>
    %c0_3 = arith.constant 0 : index
    %c0_4 = arith.constant 0 : index
    %3 = vector.load %arg3[%c0_3, %c0_4] : memref<1x32xf32, #tpu.memory_space<vmem>>, vector<1x32xf32>
    %4 = vector.broadcast %3 : vector<1x32xf32> to vector<16x32xf32>
    %5 = arith.addf %2, %4 : vector<16x32xf32>
    %6 = arith.truncf %5 : vector<16x32xf32> to vector<16x32xbf16>
    %c0_5 = arith.constant 0 : index
    %c0_6 = arith.constant 0 : index
    %7 = vector.load %arg4[%c0_5, %c0_6] : memref<16x32xbf16, #tpu.memory_space<vmem>>, vector<16x32xbf16>
    tpu.vector_store %arg4[%c0_5, %c0_6], %6 {strides = array<i32>} : memref<16x32xbf16, #tpu.memory_space<vmem>>, vector<16x32xbf16>,
    return
  }
  func.func @transform_0(%arg0: i32) -> (i32, i32) {
    %c0_i32 = arith.constant 0 : i32
    %c0_i32_0 = arith.constant 0 : i32
    return %arg0, %c0_i32 : i32, i32
  }
  func.func @transform_1(%arg0: i32) -> (i32, i32) {
    %c0_i32 = arith.constant 0 : i32
    %c0_i32_0 = arith.constant 0 : i32
    %c0_i32_1 = arith.constant 0 : i32
    return %c0_i32, %c0_i32_0 : i32, i32
  }
  func.func @transform_2(%arg0: i32) -> (i32, i32) {
    %c0_i32 = arith.constant 0 : i32
    %c0_i32_0 = arith.constant 0 : i32
    %c0_i32_1 = arith.constant 0 : i32
    return %c0_i32, %c0_i32_0 : i32, i32
  }
  func.func @transform_3(%arg0: i32) -> (i32, i32) {
    %c0_i32 = arith.constant 0 : i32
    %c0_i32_0 = arith.constant 0 : i32
    return %arg0, %c0_i32 : i32, i32
  }
}

</mosaic_0001>

<bundles_post_ra>
// kernel: tpu_custom_call.1
= control target key start
LH: loop header
LB: loop body
LE: loop exit
PB: predicated region body
PF: predicated region fallthrough
CT: control target
= control target key end

     0   :  { %s403_s0 = inlined_call_operand.vmem [shape: bf16[16,256], index: 0, kind: input, shape index: {}]   ;;  %s404_s1 = inlined_call_operand.vmem [shape: bf16[256,32], index: 1, kind: input, shape index: {}]   ;;  %s405_s2 = inlined_call_operand.vmem [shape: f32[1,32], index: 2, kind: input, shape index: {}]   ;;  %s406_s3 = inlined_call_operand.hbm [shape: bf16[16,32], index: 3, kind: output, shape index: {}]  }
   0x1   :  { %v279_v0 = vld [vmem:[%s404_s1 + $0x78] sm:$0xff]   ;;  %v281_v2 = vld [vmem:[%s404_s1 + $0x70] sm:$0xff]   ;;  %v283_v4 = vld [vmem:[%s404_s1 + $0x68] sm:$0xff]  }
   0x2   :  { %v280_v1 = vld [vmem:[%s404_s1 + $0x38] sm:$0xff]   ;;  %254 = vmatprep.subr.bf16.mxu0 %v279_v0  ;;  %v282_v3 = vld [vmem:[%s404_s1 + $0x30] sm:$0xff]   ;;  %v284_v5 = vld [vmem:[%s404_s1 + $0x28] sm:$0xff]  }
   0x3   :  { %255 = vmatpush3.bf16.msra.mxu0 %v280_v1  ;;  %v285_v6 = vld [vmem:[%s404_s1 + $0x60] sm:$0xff]   ;;  %v287_v8 = vld [vmem:[%s404_s1 + $0x58] sm:$0xff]   ;;  %v289_v10 = vld [vmem:[%s404_s1 + $0x50] sm:$0xff]  }
   0x4   :  { %256 = vmatprep.subr.bf16.mxu0 %v281_v2  ;;  %v286_v7 = vld [vmem:[%s404_s1 + $0x20] sm:$0xff]   ;;  %v288_v9 = vld [vmem:[%s404_s1 + $0x18] sm:$0xff]  }
   0x5   :  { %v297_v11 = vld [vmem:[%s403_s0 + $0x4] ss:$8 sps:$4 sm:$0xff]  }
   0x7   :  { %257 = vmatpush3.bf16.msra.mxu0 %v282_v3 }
   0x8   :  { %258 = vmatprep.subr.bf16.mxu0 %v283_v4 }
   0xb   :  { %259 = vmatpush3.bf16.msra.mxu0 %v284_v5 }
   0xc   :  { %260 = vmatprep.subr.bf16.mxu0 %v285_v6 }
   0xf   :  { %261 = vmatpush3.bf16.msra.mxu0 %v286_v7 }
  0x10   :  { %262 = vmatprep.subr.bf16.mxu0 %v287_v8 }
  0x11   :  { %8 = vsyncpa [#allocation3], 0  ;;  %v290_v12 = vld [vmem:[%s404_s1 + $0x10] sm:$0xff]   ;;  %195 = vmatprep.mubr.bf16.mxu0 %v297_v11  ;;  %v291_v13 = vld [vmem:[%s404_s1 + $0x48] sm:$0xff]   ;;  %vm212_vm0 = vcmask 257024  }
  0x12   :  { %v292_v14 = vld [vmem:[%s404_s1 + $0x8] sm:$0xff]   ;;  %v293_v15 = vld [vmem:[%s404_s1 + $0x40] sm:$0xff]  }
  0x13   :  { %263 = vmatpush3.bf16.msra.mxu0 %v288_v9  ;;  %v294_v16 = vld [vmem:[%s404_s1] sm:$0xff]   ;;  %s320_s1 = smov [#allocation2]  }
  0x14   :  { %264 = vmatprep.subr.bf16.mxu0 %v289_v10  ;;  %v295_v17 = vld [vmem:[%s403_s0] ss:$8 sps:$4 sm:$0xff]   ;;  %s220_s23 = sshll.u32 %s320_s1, 4  ;;  %s221_s23 = int_to_ptr.vmem [resolvable:$true] %s220_s23 }
  0x15   :  { %v231_v19 = vld [vmem:[%s405_s2] ss:$0 sm:$0xff]  ;;  %s298_s0 = scalar_lea.vmem %s221_s23, 128  ;;  %p303_p1 = scmp.lt.s32.totalorder %s221_s23, %s221_s23 }
  0x16   :  { %p299_p0 = scmp.ne.s32.totalorder %s221_s23, %s298_s0  ;;  %p304_p2 = scmp.lt.s32.totalorder %s298_s0, %s298_s0 }
  0x17   :  { %265 = vmatpush3.bf16.msra.mxu0 %v290_v12 }
  0x18   :  { %266 = vmatprep.subr.bf16.mxu0 %v291_v13  ;;  %p305_p3 = por %p304_p2, %p303_p1 }
  0x1a   :  { %p306_p4 = pnand %p305_p3, %p299_p0 }
  0x1b   :  { %267 = vmatpush3.bf16.msra.mxu0 %v292_v14 }
  0x1c   :  { %268 = vmatprep.subr.bf16.mxu0 %v293_v15 }
  0x1f   :  { %269 = vmatpush3.bf16.msra.mxu0 %v294_v16 }
  0x22   :  { %196 = vmatmul.mubr.bf16.vlgmr.msra.gmra.mxu0 %v295_v17 }
  0xe2   :  { %v270_v18 = vpop.f32.mrf.mxu0 }
  0xe4   :  { %v271_v20 = vpop.f32.mrf.mxu0 }
  0xe5   :  { %v272_v21 = vadd.f32 %v271_v20, %v270_v18 }
  0xe6   :  { %v273_v22 = vpop.f32.mrf.mxu0 }
  0xe7   :  { %v198_v23 = vadd.f32 %v272_v21, %v231_v19 }
  0xe8   :  { %v274_v24 = vpop.f32.mrf.mxu0 }
  0xe9   :  { %v252_v25 = vpack.c.bf16 %v198_v23, %v198_v23  ;;  %v275_v26 = vadd.f32 %v274_v24, %v273_v22 }
  0xeb   :  { %213 = vst.msk [vmem:[#allocation2] sm:$0xf] %vm212_vm0, %v252_v25  ;;  %v201_v27 = vadd.f32 %v275_v26, %v231_v19 }
  0xed   :  { %v253_v28 = vpack.c.bf16 %v201_v27, %v201_v27 }
  0xef   :  { %214 = vst.msk [vmem:[#allocation2 + $0x4] sm:$0xf] %vm212_vm0, %v253_v28 }
  0xf0   :  { %309 = shalt.err (!%p306_p4)
}
  0xf1   :  { %s321_s2 = smov 64   ;;  %s322_s24 = smov 4  }
  0xf2   :  { %226 = dma.vmem_to_hbm [thread:$0]  %s221_s23, 128, %s406_s3, [#allocation3], %s321_s2, %s321_s2, %s322_s24  }
  0xf3   :  { %318 = dma.done.wait [#allocation3], 128  }
  0xf4   :  { %319 = vsyncadd [#allocation3], 4294967168 }
  0xf5   :  { %230 = vsyncpa [#allocation3], 1 }

// kernel: tpu_custom_call.1
= control target key start
LH: loop header
LB: loop body
LE: loop exit
PB: predicated region body
PF: predicated region fallthrough
CT: control target
= control target key end

     0   :  { %s403_s0 = inlined_call_operand.vmem [shape: bf16[16,256], index: 0, kind: input, shape index: {}]   ;;  %s404_s1 = inlined_call_operand.vmem [shape: bf16[256,32], index: 1, kind: input, shape index: {}]   ;;  %s405_s2 = inlined_call_operand.vmem [shape: f32[1,32], index: 2, kind: input, shape index: {}]   ;;  %s406_s3 = inlined_call_operand.hbm [shape: bf16[16,32], index: 3, kind: output, shape index: {}]  }
   0x1   :  { %v279_v0 = vld [vmem:[%s404_s1 + $0x78] sm:$0xff]   ;;  %v281_v2 = vld [vmem:[%s404_s1 + $0x70] sm:$0xff]   ;;  %v283_v4 = vld [vmem:[%s404_s1 + $0x68] sm:$0xff]  }
   0x2   :  { %v280_v1 = vld [vmem:[%s404_s1 + $0x38] sm:$0xff]   ;;  %254 = vmatprep.subr.bf16.mxu0 %v279_v0  ;;  %v282_v3 = vld [vmem:[%s404_s1 + $0x30] sm:$0xff]   ;;  %v284_v5 = vld [vmem:[%s404_s1 + $0x28] sm:$0xff]  }
   0x3   :  { %255 = vmatpush3.bf16.msra.mxu0 %v280_v1  ;;  %v285_v6 = vld [vmem:[%s404_s1 + $0x60] sm:$0xff]   ;;  %v287_v8 = vld [vmem:[%s404_s1 + $0x58] sm:$0xff]   ;;  %v289_v10 = vld [vmem:[%s404_s1 + $0x50] sm:$0xff]  }
   0x4   :  { %256 = vmatprep.subr.bf16.mxu0 %v281_v2  ;;  %v286_v7 = vld [vmem:[%s404_s1 + $0x20] sm:$0xff]   ;;  %v288_v9 = vld [vmem:[%s404_s1 + $0x18] sm:$0xff]  }
   0x5   :  { %v297_v11 = vld [vmem:[%s403_s0 + $0x4] ss:$8 sps:$4 sm:$0xff]  }
   0x7   :  { %257 = vmatpush3.bf16.msra.mxu0 %v282_v3 }
   0x8   :  { %258 = vmatprep.subr.bf16.mxu0 %v283_v4 }
   0xb   :  { %259 = vmatpush3.bf16.msra.mxu0 %v284_v5 }
   0xc   :  { %260 = vmatprep.subr.bf16.mxu0 %v285_v6 }
   0xf   :  { %261 = vmatpush3.bf16.msra.mxu0 %v286_v7 }
  0x10   :  { %262 = vmatprep.subr.bf16.mxu0 %v287_v8 }
  0x11   :  { %8 = vsyncpa [#allocation3], 0  ;;  %v290_v12 = vld [vmem:[%s404_s1 + $0x10] sm:$0xff]   ;;  %195 = vmatprep.mubr.bf16.mxu0 %v297_v11  ;;  %v291_v13 = vld [vmem:[%s404_s1 + $0x48] sm:$0xff]   ;;  %vm212_vm0 = vcmask 257024  }
  0x12   :  { %v292_v14 = vld [vmem:[%s404_s1 + $0x8] sm:$0xff]   ;;  %v293_v15 = vld [vmem:[%s404_s1 + $0x40] sm:$0xff]  }
  0x13   :  { %263 = vmatpush3.bf16.msra.mxu0 %v288_v9  ;;  %v294_v16 = vld [vmem:[%s404_s1] sm:$0xff]   ;;  %s320_s1 = smov [#allocation2]  }
  0x14   :  { %264 = vmatprep.subr.bf16.mxu0 %v289_v10  ;;  %v295_v17 = vld [vmem:[%s403_s0] ss:$8 sps:$4 sm:$0xff]   ;;  %s220_s23 = sshll.u32 %s320_s1, 4  ;;  %s221_s23 = int_to_ptr.vmem [resolvable:$true] %s220_s23 }
  0x15   :  { %v231_v19 = vld [vmem:[%s405_s2] ss:$0 sm:$0xff]  ;;  %s298_s0 = scalar_lea.vmem %s221_s23, 128  ;;  %p303_p1 = scmp.lt.s32.totalorder %s221_s23, %s221_s23 }
  0x16   :  { %p299_p0 = scmp.ne.s32.totalorder %s221_s23, %s298_s0  ;;  %p304_p2 = scmp.lt.s32.totalorder %s298_s0, %s298_s0 }
  0x17   :  { %265 = vmatpush3.bf16.msra.mxu0 %v290_v12 }
  0x18   :  { %266 = vmatprep.subr.bf16.mxu0 %v291_v13  ;;  %p305_p3 = por %p304_p2, %p303_p1 }
  0x1a   :  { %p306_p4 = pnand %p305_p3, %p299_p0 }
  0x1b   :  { %267 = vmatpush3.bf16.msra.mxu0 %v292_v14 }
  0x1c   :  { %268 = vmatprep.subr.bf16.mxu0 %v293_v15 }
  0x1f   :  { %269 = vmatpush3.bf16.msra.mxu0 %v294_v16 }
  0x22   :  { %196 = vmatmul.mubr.bf16.vlgmr.msra.gmra.mxu0 %v295_v17 }
  0xe2   :  { %v270_v18 = vpop.f32.mrf.mxu0 }
  0xe4   :  { %v271_v20 = vpop.f32.mrf.mxu0 }
  0xe5   :  { %v272_v21 = vadd.f32 %v271_v20, %v270_v18 }
  0xe6   :  { %v273_v22 = vpop.f32.mrf.mxu0 }
  0xe7   :  { %v198_v23 = vadd.f32 %v272_v21, %v231_v19 }
  0xe8   :  { %v274_v24 = vpop.f32.mrf.mxu0 }
  0xe9   :  { %v252_v25 = vpack.c.bf16 %v198_v23, %v198_v23  ;;  %v275_v26 = vadd.f32 %v274_v24, %v273_v22 }
  0xeb   :  { %213 = vst.msk [vmem:[#allocation2] sm:$0xf] %vm212_vm0, %v252_v25  ;;  %v201_v27 = vadd.f32 %v275_v26, %v231_v19 }
  0xed   :  { %v253_v28 = vpack.c.bf16 %v201_v27, %v201_v27 }
  0xef   :  { %214 = vst.msk [vmem:[#allocation2 + $0x4] sm:$0xf] %vm212_vm0, %v253_v28 }
  0xf0   :  { %309 = shalt.err (!%p306_p4)
}
  0xf1   :  { %s321_s2 = smov 64   ;;  %s322_s24 = smov 4  }
  0xf2   :  { %226 = dma.vmem_to_hbm [thread:$0]  %s221_s23, 128, %s406_s3, [#allocation3], %s321_s2, %s321_s2, %s322_s24  }
  0xf3   :  { %318 = dma.done.wait [#allocation3], 128  }
  0xf4   :  { %319 = vsyncadd [#allocation3], 4294967168 }
  0xf5   :  { %230 = vsyncpa [#allocation3], 1 }

</bundles_post_ra>
